<compile_context>
chip_gen: v6e
topology: v6e:2x2x1
jax: 0.10.0
libtpu: 0.0.40
codegen_flags: <defaults>
</compile_context>

<pallas_src>
import math

import jax
import jax.numpy as jnp
from jax.experimental import pallas as pl
from jax.experimental.pallas import tpu as pltpu


def _round_up(a: int, b: int) -> int:
    return (a + b - 1) // b * b


def _erf_f32(x):
    """f32 erf via the rational polynomial XLA/Eigen use (|x| clamped to 4)."""
    x = jnp.clip(x, -4.0, 4.0)
    x2 = x * x
    alpha = (-2.72614225801306e-10, 2.77068142495902e-08, -2.10102402082508e-06,
             -5.69250639462346e-05, -7.34990630326855e-04, -2.95459980854025e-03,
             -1.60960333262415e-02)
    beta = (-1.45660718464996e-05, -2.13374055278905e-04, -1.68282697438203e-03,
            -7.37332916720468e-03, -1.42647390514189e-02)
    p = jnp.float32(alpha[0])
    for c in alpha[1:]:
        p = p * x2 + jnp.float32(c)
    q = jnp.float32(beta[0])
    for c in beta[1:]:
        q = q * x2 + jnp.float32(c)
    return x * p / q


def _gelu_exact(x):
    # PyTorch nn.GELU() default: 0.5 * x * (1 + erf(x / sqrt(2)))
    return 0.5 * x * (1.0 + _erf_f32(x * jnp.float32(1.0 / math.sqrt(2.0))))


def _mlp_kernel(x_ref, w1_ref, b1_ref, w2_ref, b2_ref, o_ref):
    # x_ref: (TR, E) row tile; weights/biases are fully resident in VMEM.
    x = x_ref[...].astype(jnp.float32)
    h = jnp.dot(x, w1_ref[...].astype(jnp.float32),
                preferred_element_type=jnp.float32)
    h = h + b1_ref[...].astype(jnp.float32)
    h = _gelu_exact(h)
    y = jnp.dot(h, w2_ref[...].astype(jnp.float32),
                preferred_element_type=jnp.float32)
    y = y + b2_ref[...].astype(jnp.float32)
    o_ref[...] = y.astype(o_ref.dtype)


def mlp_block(x, w1, b1, w2, b2, *, max_tile_rows: int = 512):
    """Fused MLPBlock forward: lin2(gelu(lin1(x))).

    x: (..., E); w1: (E, M) (= lin1.weight.T); b1: (M,);
    w2: (M, E) (= lin2.weight.T); b2: (E,). Returns (..., E).
    """
    orig_shape = x.shape
    E = orig_shape[-1]
    M = w1.shape[-1]
    assert w1.shape == (E, M) and b1.shape == (M,)
    assert w2.shape == (M, E) and b2.shape == (E,)

    rows = math.prod(orig_shape[:-1])
    x2d = x.reshape(rows, E)

    x_bytes = jnp.dtype(x.dtype).itemsize
    w_bytes = jnp.dtype(w1.dtype).itemsize
    # VMEM working-set estimate: resident weights/biases (x2 headroom for the
    # pipeline's buffering) + double-buffered x/out row tiles + f32 temporaries.
    weight_bytes = 2 * (E * M + M + M * E + E) * w_bytes
    per_row_bytes = 2 * E * x_bytes + 2 * E * x_bytes + 4 * (M + E)
    budget = 48 * 1024 * 1024  # conservative: fits v7x's 64 MiB physical VMEM
    # TODO(synk): tile W1/W2 over the hidden (mlp_dim) axis when the resident
    # weights alone exceed the VMEM budget; current kernel assumes they fit.

    rows_fitting = max((budget - weight_bytes) // per_row_bytes, 8)
    tr = min(max_tile_rows, _round_up(rows, 8), (rows_fitting // 8) * 8)
    tr = max(_round_up(tr, 8), 8)

    rows_padded = _round_up(rows, tr)
    if rows_padded != rows:
        x2d = jnp.pad(x2d, ((0, rows_padded - rows), (0, 0)))

    vmem_limit = int(min(max(weight_bytes + tr * per_row_bytes + (4 << 20),
                             32 * 1024 * 1024),
                         64 * 1024 * 1024))

    out2d = pl.pallas_call(
        _mlp_kernel,
        out_shape=jax.ShapeDtypeStruct((rows_padded, E), x.dtype),
        grid_spec=pltpu.PrefetchScalarGridSpec(
            num_scalar_prefetch=0,
            grid=(rows_padded // tr,),
            in_specs=[
                pl.BlockSpec((tr, E), lambda i: (i, 0)),   # x row tile
                pl.BlockSpec((E, M), lambda i: (0, 0)),    # W1 (resident)
                pl.BlockSpec((1, M), lambda i: (0, 0)),    # b1 (resident)
                pl.BlockSpec((M, E), lambda i: (0, 0)),    # W2 (resident)
                pl.BlockSpec((1, E), lambda i: (0, 0)),    # b2 (resident)
            ],
            out_specs=pl.BlockSpec((tr, E), lambda i: (i, 0)),
        ),
        compiler_params=pltpu.CompilerParams(
            dimension_semantics=("parallel",),
            vmem_limit_bytes=vmem_limit,
        ),
    )(x2d, w1, b1.reshape(1, M), w2, b2.reshape(1, E))

    return out2d[:rows].reshape(orig_shape)


def _reference(x, w1, b1, w2, b2):
    hi = jax.lax.Precision.HIGHEST
    h = jnp.dot(x, w1, precision=hi) + b1
    h = jax.nn.gelu(h, approximate=False)   # exact GELU = PyTorch nn.GELU()
    return jnp.dot(h, w2, precision=hi) + b2


if __name__ == "__main__":
    key = jax.random.PRNGKey(0)
    k_x, k_w1, k_b1, k_w2, k_b2 = jax.random.split(key, 5)

    batch, seq, embedding_dim, mlp_dim = 2, 8, 32, 64
    x = jax.random.normal(k_x, (batch, seq, embedding_dim), dtype=jnp.float32)

    # Parameters stored pre-transposed (w = torch_linear.weight.T).
    w1 = jax.random.normal(k_w1, (embedding_dim, mlp_dim), jnp.float32) * 0.05
    b1 = jax.random.normal(k_b1, (mlp_dim,), jnp.float32) * 0.05
    w2 = jax.random.normal(k_w2, (mlp_dim, embedding_dim), jnp.float32) * 0.05
    b2 = jax.random.normal(k_b2, (embedding_dim,), jnp.float32) * 0.05

    out = mlp_block(x, w1, b1, w2, b2)
    out = jax.block_until_ready(out)

    ref = _reference(x, w1, b1, w2, b2)
    assert out.shape == x.shape
    err = float(jnp.max(jnp.abs(out - ref)))
    assert jnp.allclose(out, ref, atol=1e-4, rtol=1e-4), f"max abs err {err}"

    print("KERNEL_OK")
</pallas_src>

<mosaic_0001>
module attributes {stable_mosaic.version = 11 : i64} {
  func.func @_mlp_kernel(%arg0: i32, %arg1: memref<16x32xf32, #tpu.memory_space<vmem>>, %arg2: memref<32x64xf32, #tpu.memory_space<vmem>>, %arg3: memref<1x64xf32, #tpu.memory_space<vmem>>, %arg4: memref<64x32xf32, #tpu.memory_space<vmem>>, %arg5: memref<1x32xf32, #tpu.memory_space<vmem>>, %arg6: memref<16x32xf32, #tpu.memory_space<vmem>>) attributes {dimension_semantics = [#tpu.dimension_semantics<parallel>], iteration_bounds = array<i64: 1>, scalar_prefetch = 0 : i64, scratch_operands = 0 : i64, tpu.core_type = #tpu.core_type<tc>, window_params = [{transform_indices = @transform_0, window_bounds = array<i64: 16, 32>}, {pipeline_mode = #tpu.pipeline_mode<synchronous>, transform_indices = @transform_1, window_bounds = array<i64: 32, 64>}, {pipeline_mode = #tpu.pipeline_mode<synchronous>, transform_indices = @transform_2, window_bounds = array<i64: 1, 64>}, {pipeline_mode = #tpu.pipeline_mode<synchronous>, transform_indices = @transform_3, window_bounds = array<i64: 64, 32>}, {pipeline_mode = #tpu.pipeline_mode<synchronous>, transform_indices = @transform_4, window_bounds = array<i64: 1, 32>}, {transform_indices = @transform_5, window_bounds = array<i64: 16, 32>}]} {
    %c0 = arith.constant 0 : index
    %c0_0 = arith.constant 0 : index
    %0 = vector.load %arg1[%c0, %c0_0] : memref<16x32xf32, #tpu.memory_space<vmem>>, vector<16x32xf32>
    %c0_1 = arith.constant 0 : index
    %c0_2 = arith.constant 0 : index
    %1 = vector.load %arg2[%c0_1, %c0_2] : memref<32x64xf32, #tpu.memory_space<vmem>>, vector<32x64xf32>
    %cst = arith.constant dense<0.000000e+00> : vector<16x64xf32>
    %2 = tpu.matmul %0, %1, %cst {dimension_numbers = #tpu.dot_dimension_numbers<[1], [0], [0], [1], [0, 0, 1, 1], [], []>} : vector<16x32xf32>, vector<32x64xf32>, vector<16x64xf32> -> vector<16x64xf32>
    %c0_3 = arith.constant 0 : index
    %c0_4 = arith.constant 0 : index
    %3 = vector.load %arg3[%c0_3, %c0_4] : memref<1x64xf32, #tpu.memory_space<vmem>>, vector<1x64xf32>
    %4 = vector.broadcast %3 : vector<1x64xf32> to vector<16x64xf32>
    %5 = arith.addf %2, %4 : vector<16x64xf32>
    %cst_5 = arith.constant 5.000000e-01 : f32
    %6 = vector.broadcast %cst_5 : f32 to vector<16x64xf32>
    %7 = arith.mulf %6, %5 : vector<16x64xf32>
    %cst_6 = arith.constant 0.707106769 : f32
    %8 = vector.broadcast %cst_6 : f32 to vector<16x64xf32>
    %9 = arith.mulf %5, %8 : vector<16x64xf32>
    %cst_7 = arith.constant -4.000000e+00 : f32
    %cst_8 = arith.constant 4.000000e+00 : f32
    %10 = vector.broadcast %cst_7 : f32 to vector<16x64xf32>
    %11 = arith.maximumf %10, %9 : vector<16x64xf32>
    %12 = vector.broadcast %cst_8 : f32 to vector<16x64xf32>
    %13 = arith.minimumf %12, %11 : vector<16x64xf32>
    %14 = arith.mulf %13, %13 : vector<16x64xf32>
    %cst_9 = arith.constant -2.72614237E-10 : f32
    %15 = vector.broadcast %cst_9 : f32 to vector<16x64xf32>
    %16 = arith.mulf %15, %14 : vector<16x64xf32>
    %cst_10 = arith.constant 2.77068146E-8 : f32
    %17 = vector.broadcast %cst_10 : f32 to vector<16x64xf32>
    %18 = arith.addf %16, %17 : vector<16x64xf32>
    %19 = arith.mulf %18, %14 : vector<16x64xf32>
    %cst_11 = arith.constant -2.10102394E-6 : f32
    %20 = vector.broadcast %cst_11 : f32 to vector<16x64xf32>
    %21 = arith.addf %19, %20 : vector<16x64xf32>
    %22 = arith.mulf %21, %14 : vector<16x64xf32>
    %cst_12 = arith.constant -5.69250624E-5 : f32
    %23 = vector.broadcast %cst_12 : f32 to vector<16x64xf32>
    %24 = arith.addf %22, %23 : vector<16x64xf32>
    %25 = arith.mulf %24, %14 : vector<16x64xf32>
    %cst_13 = arith.constant -7.34990637E-4 : f32
    %26 = vector.broadcast %cst_13 : f32 to vector<16x64xf32>
    %27 = arith.addf %25, %26 : vector<16x64xf32>
    %28 = arith.mulf %27, %14 : vector<16x64xf32>
    %cst_14 = arith.constant -2.954600e-03 : f32
    %29 = vector.broadcast %cst_14 : f32 to vector<16x64xf32>
    %30 = arith.addf %28, %29 : vector<16x64xf32>
    %31 = arith.mulf %30, %14 : vector<16x64xf32>
    %cst_15 = arith.constant -0.0160960332 : f32
    %32 = vector.broadcast %cst_15 : f32 to vector<16x64xf32>
    %33 = arith.addf %31, %32 : vector<16x64xf32>
    %cst_16 = arith.constant -1.45660715E-5 : f32
    %34 = vector.broadcast %cst_16 : f32 to vector<16x64xf32>
    %35 = arith.mulf %34, %14 : vector<16x64xf32>
    %cst_17 = arith.constant -2.13374049E-4 : f32
    %36 = vector.broadcast %cst_17 : f32 to vector<16x64xf32>
    %37 = arith.addf %35, %36 : vector<16x64xf32>
    %38 = arith.mulf %37, %14 : vector<16x64xf32>
    %cst_18 = arith.constant -0.00168282702 : f32
    %39 = vector.broadcast %cst_18 : f32 to vector<16x64xf32>
    %40 = arith.addf %38, %39 : vector<16x64xf32>
    %41 = arith.mulf %40, %14 : vector<16x64xf32>
    %cst_19 = arith.constant -0.00737332925 : f32
    %42 = vector.broadcast %cst_19 : f32 to vector<16x64xf32>
    %43 = arith.addf %41, %42 : vector<16x64xf32>
    %44 = arith.mulf %43, %14 : vector<16x64xf32>
    %cst_20 = arith.constant -0.0142647391 : f32
    %45 = vector.broadcast %cst_20 : f32 to vector<16x64xf32>
    %46 = arith.addf %44, %45 : vector<16x64xf32>
    %47 = arith.mulf %13, %33 : vector<16x64xf32>
    %48 = arith.divf %47, %46 : vector<16x64xf32>
    %cst_21 = arith.constant 1.000000e+00 : f32
    %49 = vector.broadcast %cst_21 : f32 to vector<16x64xf32>
    %50 = arith.addf %49, %48 : vector<16x64xf32>
    %51 = arith.mulf %7, %50 : vector<16x64xf32>
    %c0_22 = arith.constant 0 : index
    %c0_23 = arith.constant 0 : index
    %52 = vector.load %arg4[%c0_22, %c0_23] : memref<64x32xf32, #tpu.memory_space<vmem>>, vector<64x32xf32>
    %cst_24 = arith.constant dense<0.000000e+00> : vector<16x32xf32>
    %53 = tpu.matmul %51, %52, %cst_24 {dimension_numbers = #tpu.dot_dimension_numbers<[1], [0], [0], [1], [0, 0, 1, 1], [], []>} : vector<16x64xf32>, vector<64x32xf32>, vector<16x32xf32> -> vector<16x32xf32>
    %c0_25 = arith.constant 0 : index
    %c0_26 = arith.constant 0 : index
    %54 = vector.load %arg5[%c0_25, %c0_26] : memref<1x32xf32, #tpu.memory_space<vmem>>, vector<1x32xf32>
    %55 = vector.broadcast %54 : vector<1x32xf32> to vector<16x32xf32>
    %56 = arith.addf %53, %55 : vector<16x32xf32>
    %c0_27 = arith.constant 0 : index
    %c0_28 = arith.constant 0 : index
    %57 = vector.load %arg6[%c0_27, %c0_28] : memref<16x32xf32, #tpu.memory_space<vmem>>, vector<16x32xf32>
    tpu.vector_store %arg6[%c0_27, %c0_28], %56 {strides = array<i32>} : memref<16x32xf32, #tpu.memory_space<vmem>>, vector<16x32xf32>,
    return
  }
  func.func @transform_0(%arg0: i32) -> (i32, i32) {
    %c0_i32 = arith.constant 0 : i32
    %c0_i32_0 = arith.constant 0 : i32
    return %arg0, %c0_i32 : i32, i32
  }
  func.func @transform_1(%arg0: i32) -> (i32, i32) {
    %c0_i32 = arith.constant 0 : i32
    %c0_i32_0 = arith.constant 0 : i32
    %c0_i32_1 = arith.constant 0 : i32
    return %c0_i32, %c0_i32_0 : i32, i32
  }
  func.func @transform_2(%arg0: i32) -> (i32, i32) {
    %c0_i32 = arith.constant 0 : i32
    %c0_i32_0 = arith.constant 0 : i32
    %c0_i32_1 = arith.constant 0 : i32
    return %c0_i32, %c0_i32_0 : i32, i32
  }
  func.func @transform_3(%arg0: i32) -> (i32, i32) {
    %c0_i32 = arith.constant 0 : i32
    %c0_i32_0 = arith.constant 0 : i32
    %c0_i32_1 = arith.constant 0 : i32
    return %c0_i32, %c0_i32_0 : i32, i32
  }
  func.func @transform_4(%arg0: i32) -> (i32, i32) {
    %c0_i32 = arith.constant 0 : i32
    %c0_i32_0 = arith.constant 0 : i32
    %c0_i32_1 = arith.constant 0 : i32
    return %c0_i32, %c0_i32_0 : i32, i32
  }
  func.func @transform_5(%arg0: i32) -> (i32, i32) {
    %c0_i32 = arith.constant 0 : i32
    %c0_i32_0 = arith.constant 0 : i32
    return %arg0, %c0_i32 : i32, i32
  }
}

</mosaic_0001>

<bundles_post_ra>
// kernel: tpu_custom_call.1
= control target key start
LH: loop header
LB: loop body
LE: loop exit
PB: predicated region body
PF: predicated region fallthrough
CT: control target
= control target key end

     0   :  { %vm34_vm0 = vcmask 261120   ;;  %s462_s0 = inlined_call_operand.vmem [shape: f32[16,32], index: 0, kind: input, shape index: {}]   ;;  %s463_s1 = inlined_call_operand.vmem [shape: f32[32,64], index: 1, kind: input, shape index: {}]   ;;  %s464_s2 = inlined_call_operand.vmem [shape: f32[1,64], index: 2, kind: input, shape index: {}]   ;;  %s465_s3 = inlined_call_operand.vmem [shape: f32[64,32], index: 3, kind: input, shape index: {}]   ;;  %s466_s4 = inlined_call_operand.vmem [shape: f32[1,32], index: 4, kind: input, shape index: {}]   ;;  %s467_s5 = inlined_call_operand.hbm [shape: f32[16,32], index: 5, kind: output, shape index: {}]  }
   0x1   :  { %v26_v0 = vld [vmem:[%s463_s1 + $0x18] sm:$0xff]  ;;  %v25_v1 = vld [vmem:[%s463_s1 + $0x10] sm:$0xff]  ;;  %v21_v2 = vld [vmem:[%s462_s0] sm:$0xff] }
   0x2   :  { %315 = vmatprep.subr.mxu0 %v26_v0  ;;  %v24_v3 = vld [vmem:[%s463_s1 + $0x8] sm:$0xff]  ;;  %323 = vmatprep.mubr.msk.f32.mxu0 %vm34_vm0, %v21_v2 }
   0x3   :  { %316 = vmatpush3.msra.mxu0 %v26_v0 }
   0x4   :  { %10 = vsyncpa [#allocation3], 0  ;;  %317 = vmatprep.subr.mxu0 %v25_v1  ;;  %v23_v4 = vld [vmem:[%s463_s1] sm:$0xff]  ;;  %v22_v5 = vld [vmem:[%s462_s0 + $0x8] sm:$0xff]  ;;  %vm191_vm1 = vcmask 523264   ;;  %s374_s21 = smov [#allocation2]  }
   0x5   :  { %318 = vmatpush3.msra.mxu0 %v25_v1  ;;  %v183_v6 = vld [vmem:[%s465_s3 + $0x38] sm:$0xff]  ;;  %v182_v7 = vld [vmem:[%s465_s3 + $0x30] sm:$0xff]  ;;  %v181_v8 = vld [vmem:[%s465_s3 + $0x28] sm:$0xff]  ;;  %s280_s22 = sshll.u32 %s374_s21, 4  ;;  %s281_s22 = int_to_ptr.vmem [resolvable:$true] %s280_s22 }
   0x6   :  { %319 = vmatprep.subr.mxu0 %v24_v3  ;;  %326 = vmatprep.subr.mxu1 %v183_v6  ;;  %v180_v9 = vld [vmem:[%s465_s3 + $0x20] sm:$0xff]  ;;  %v179_v10 = vld [vmem:[%s465_s3 + $0x18] sm:$0xff]  ;;  %v178_v11 = vld [vmem:[%s465_s3 + $0x10] sm:$0xff]  ;;  %s352_s23 = scalar_lea.vmem %s281_s22, 256  ;;  %p357_p1 = scmp.lt.s32.totalorder %s281_s22, %s281_s22 }
   0x7   :  { %320 = vmatpush3.msra.mxu0 %v24_v3  ;;  %327 = vmatpush3.msra.mxu1 %v183_v6  ;;  %v177_v12 = vld [vmem:[%s465_s3 + $0x8] sm:$0xff]  ;;  %v176_v13 = vld [vmem:[%s465_s3] sm:$0xff]  ;;  %p353_p0 = scmp.ne.s32.totalorder %s281_s22, %s352_s23  ;;  %p358_p2 = scmp.lt.s32.totalorder %s352_s23, %s352_s23 }
   0x8   :  { %321 = vmatprep.subr.mxu0 %v23_v4  ;;  %328 = vmatprep.subr.mxu1 %v182_v7  ;;  %v291_v14 = vld [vmem:[%s464_s2] ss:$0 sm:$0xff] }
   0x9   :  { %322 = vmatpush3.msra.mxu0 %v23_v4  ;;  %329 = vmatpush3.msra.mxu1 %v182_v7  ;;  %p359_p3 = por %p358_p2, %p357_p1 }
   0xa   :  { %324 = vmatmul.mubr.msk.f32.vlgmr.msra.gmra.mxu0 %vm34_vm0, %v22_v5  ;;  %330 = vmatprep.subr.mxu1 %v181_v8 }
   0xb   :  { %331 = vmatpush3.msra.mxu1 %v181_v8  ;;  %p360_p4 = pnand %p359_p3, %p353_p0 }
   0xc   :  { %332 = vmatprep.subr.mxu1 %v180_v9 }
   0xd   :  { %333 = vmatpush3.msra.mxu1 %v180_v9 }
   0xe   :  { %334 = vmatprep.subr.mxu1 %v179_v10 }
   0xf   :  { %335 = vmatpush3.msra.mxu1 %v179_v10 }
  0x10   :  { %336 = vmatprep.subr.mxu1 %v178_v11 }
  0x11   :  { %337 = vmatpush3.msra.mxu1 %v178_v11 }
  0x12   :  { %338 = vmatprep.subr.mxu1 %v177_v12 }
  0x13   :  { %339 = vmatpush3.msra.mxu1 %v177_v12 }
  0x14   :  { %340 = vmatprep.subr.mxu1 %v176_v13 }
  0x15   :  { %341 = vmatpush3.msra.mxu1 %v176_v13  ;;  %v296_v13 = vld [vmem:[%s466_s4] ss:$0 sm:$0xff] }
  0xca   :  { %v325_v15 = vpop.f32.mrf.mxu0 }
  0xcb   :  { %v113_v16 = vadd.f32 %v325_v15, %v291_v14 }
  0xcc   :  { %v107_v17 = vpop.f32.mrf.mxu0 }
  0xcd   :  { %v119_v18 = vmul.f32 0.70710677, %v113_v16  ;;  %v108_v19 = vadd.f32 %v291_v14, %v107_v17  ;;  %v117_v10 = vmul.f32 0.5, %v113_v16 }
  0xcf   :  { %v295_v20 = vclamps-f32 %v119_v18, 4.0  ;;  %v118_v21 = vmul.f32 0.70710677, %v108_v19  ;;  %v116_v8 = vmul.f32 0.5, %v108_v19 }
  0xd1   :  { %v125_v22 = vmul.f32 %v295_v20, %v295_v20  ;;  %v294_v23 = vclamps-f32 %v118_v21, 4.0 }
  0xd3   :  { %v127_v24 = vmul.f32 -2.7261424e-10, %v125_v22  ;;  %v151_v25 = vmul.f32 -1.45660715e-05, %v125_v22  ;;  %v124_v26 = vmul.f32 %v294_v23, %v294_v23 }
  0xd5   :  { %v129_v27 = vadd.f32 2.7706815e-08, %v127_v24  ;;  %v153_v28 = vadd.f32 -0.00021337405, %v151_v25  ;;  %v126_v29 = vmul.f32 -2.7261424e-10, %v124_v26 }
  0xd6   :  { %v150_v30 = vmul.f32 -1.45660715e-05, %v124_v26 }
  0xd7   :  { %v131_v31 = vmul.f32 %v129_v27, %v125_v22  ;;  %v155_v32 = vmul.f32 %v153_v28, %v125_v22  ;;  %v128_v33 = vadd.f32 2.7706815e-08, %v126_v29 }
  0xd8   :  { %v152_v34 = vadd.f32 -0.00021337405, %v150_v30 }
  0xd9   :  { %v133_v35 = vadd.f32 -2.101024e-06, %v131_v31  ;;  %v157_v36 = vadd.f32 -0.001682827, %v155_v32  ;;  %v130_v37 = vmul.f32 %v128_v33, %v124_v26 }
  0xda   :  { %v154_v38 = vmul.f32 %v152_v34, %v124_v26 }
  0xdb   :  { %v135_v39 = vmul.f32 %v133_v35, %v125_v22  ;;  %v159_v40 = vmul.f32 %v157_v36, %v125_v22  ;;  %v132_v41 = vadd.f32 -2.101024e-06, %v130_v37 }
  0xdc   :  { %v156_v42 = vadd.f32 -0.001682827, %v154_v38 }
  0xdd   :  { %v137_v43 = vadd.f32 -5.6925062e-05, %v135_v39  ;;  %v161_v44 = vadd.f32 -0.0073733293, %v159_v40  ;;  %v134_v45 = vmul.f32 %v132_v41, %v124_v26 }
  0xde   :  { %v158_v46 = vmul.f32 %v156_v42, %v124_v26 }
  0xdf   :  { %v139_v47 = vmul.f32 %v137_v43, %v125_v22  ;;  %v163_v48 = vmul.f32 %v161_v44, %v125_v22  ;;  %v136_v49 = vadd.f32 -5.6925062e-05, %v134_v45 }
  0xe0   :  { %v160_v50 = vadd.f32 -0.0073733293, %v158_v46 }
  0xe1   :  { %v141_v51 = vadd.f32 -0.00073499064, %v139_v47  ;;  %v165_v52 = vadd.f32 -0.014264739, %v163_v48  ;;  %v138_v53 = vmul.f32 %v136_v49, %v124_v26 }
  0xe2   :  { %v162_v54 = vmul.f32 %v160_v50, %v124_v26 }
  0xe3   :  { %v143_v55 = vmul.f32 %v141_v51, %v125_v22  ;;  %348 = vrcp.f32 %v165_v52  ;;  %v140_v56 = vadd.f32 -0.00073499064, %v138_v53 }
  0xe4   :  { %v164_v57 = vadd.f32 -0.014264739, %v162_v54 }
  0xe5   :  { %v145_v58 = vadd.f32 -0.0029546, %v143_v55  ;;  %v142_v59 = vmul.f32 %v140_v56, %v124_v26 }
  0xe6   :  { %350 = vrcp.f32 %v164_v57 }
  0xe7   :  { %v147_v60 = vmul.f32 %v145_v58, %v125_v22  ;;  %v144_v61 = vadd.f32 -0.0029546, %v142_v59 }
  0xe9   :  { %v146_v62 = vmul.f32 %v144_v61, %v124_v26  ;;  %v149_v63 = vadd.f32 -0.016096033, %v147_v60 }
  0xeb   :  { %v148_v0 = vadd.f32 -0.016096033, %v146_v62  ;;  %v167_v1 = vmul.f32 %v295_v20, %v149_v63 }
  0xed   :  { %v166_v4 = vmul.f32 %v294_v23, %v148_v0 }
  0xf0   :  { %v349_v2 = vpop.eup %348 }
  0xf1   :  { %v171_v3 = vmul.f32 %v349_v2, %v167_v1 }
  0xf3   :  { %v351_v5 = vpop.eup %350  ;;  %v173_v7 = vadd.f32 1.0, %v171_v3 }
  0xf4   :  { %v169_v6 = vmul.f32 %v351_v5, %v166_v4 }
  0xf5   :  { %v175_v12 = vmul.f32 %v173_v7, %v117_v10 }
  0xf6   :  { %v172_v9 = vadd.f32 1.0, %v169_v6 }
  0xf8   :  { %v174_v11 = vmul.f32 %v172_v9, %v116_v8 }
  0xfa   :  { %342 = vmatprep.mubr.msk.f32.mxu1 %vm191_vm1, %v174_v11 }
  0xfb   :  { %343 = vmatmul.mubr.msk.f32.vlgmr.msra.gmra.mxu1 %vm191_vm1, %v175_v12 }
 0x1bb   :  { %v344_v14 = vpop.f32.mrf.mxu1 }
 0x1bc   :  { %v270_v15 = vadd.f32 %v344_v14, %v296_v13 }
 0x1bd   :  { %v264_v17 = vpop.f32.mrf.mxu1 }
 0x1be   :  { %274 = vst.msk [vmem:[#allocation2 + $0x8] sm:$0xff] %vm34_vm0, %v270_v15  ;;  %v265_v18 = vadd.f32 %v296_v13, %v264_v17 }
 0x1c0   :  { %273 = vst.msk [vmem:[#allocation2] sm:$0xff] %vm34_vm0, %v265_v18 }
 0x1c1   :  { %363 = shalt.err (!%p360_p4)
}
 0x1c2   :  { %s375_s24 = smov 128   ;;  %s376_s4 = smov 8  }
 0x1c3   :  { %286 = dma.vmem_to_hbm [thread:$0]  %s281_s22, 256, %s467_s5, [#allocation3], %s375_s24, %s375_s24, %s376_s4  }
 0x1c4   :  { %372 = dma.done.wait [#allocation3], 256  }
 0x1c5   :  { %373 = vsyncadd [#allocation3], 4294967040 }
 0x1c6   :  { %290 = vsyncpa [#allocation3], 1 }

</bundles_post_ra>
